<compile_context>
chip_gen: v7x
topology: tpu7x:2x2x1
jax: 0.10.0
libtpu: 0.0.40
codegen_flags: <defaults>
</compile_context>

<pallas_src>
import jax
import jax.numpy as jnp
from jax.experimental import pallas as pl
from jax.experimental.pallas import tpu as pltpu


def _normalization_kernel(mb_ref, img_ref, out_ref):
    # mb_ref  : VMEM (block_rows, 2) float32 -- [:, 0]=mean, [:, 1]=1/std
    # img_ref : VMEM (block_rows, block_cols) native dtype
    # out_ref : VMEM (block_rows, block_cols) out dtype
    x = img_ref[...].astype(jnp.float32)
    mean = mb_ref[:, 0:1]
    inv_std = mb_ref[:, 1:2]
    out_ref[...] = ((x - mean) * inv_std).astype(out_ref.dtype)


def _round_up(x, m):
    return ((x + m - 1) // m) * m


def _device_tuning():
    """Return (row_cap, col_cap, vmem_limit_bytes, is_v7) for the local TPU."""
    try:
        kind = (jax.devices()[0].device_kind or "").lower()
    except Exception:  # pragma: no cover - be robust if device query fails
        kind = ""
    is_v7 = ("v7" in kind) or ("tpu7" in kind) or ("7x" in kind)
    is_v6 = ("v6" in kind) or ("6e" in kind)
    if is_v6:
        # 128 MiB VMEM: 256x4096 f32 tiles, in+out double-buffered ~16-24 MiB.
        return 256, 4096, 64 << 20, False
    if is_v7:
        # 64 MiB VMEM / 2 TCs: keep the footprint small (~8 MiB), split grid.
        return 256, 2048, None, True
    # v5e / default: 8 MiB double-buffered footprint fits the 16 MiB default.
    return 256, 2048, None, False


def normalization(img, mean, std, out_dtype=jnp.float32):
    """img: (N, C, H, W); mean, std: (C,).
    Returns (img - mean[:,None,None]) / std[:,None,None] as `out_dtype`
    (default float32; pass jnp.bfloat16 to halve HBM writeback traffic)."""
    N, C, H, W = img.shape
    R = N * C            # rows: one per (n, c) channel plane
    L = H * W            # lanes: contiguous spatial plane

    # Free view: each (n, c) plane is contiguous in NCHW layout.
    x2d = img.reshape(R, L)

    # Per-row (mean, 1/std), packed into one small array -> one resident block.
    mean_c = mean.astype(jnp.float32).reshape(C)
    inv_std_c = (1.0 / std.astype(jnp.float32)).reshape(C)
    mb_rows = jnp.tile(jnp.stack([mean_c, inv_std_c], axis=1), (N, 1))  # (R, 2)

    row_cap, col_cap, vmem_limit, is_v7 = _device_tuning()

    # Sublane multiple depends on the (packed) input dtype.
    in_itemsize = jnp.dtype(img.dtype).itemsize
    row_mult = {4: 8, 2: 16, 1: 32}.get(in_itemsize, 8)

    # Lane (last) block dim: always a 128-multiple (ragged tail masked), unless
    # the whole extent is small enough to take exactly.
    if L % 128 == 0 or L < 128:
        block_cols = min(L, col_cap)
    elif L <= col_cap:
        block_cols = L                      # full extent, small -> legal as-is
    else:
        block_cols = col_cap                # 128-multiple, ragged tail masked

    # Sublane block dim: aligned to the packing multiple, tail masked.
    if R % row_mult == 0:
        block_rows = min(R, row_cap)
    elif R <= row_cap:
        block_rows = R                      # full extent
    else:
        block_rows = row_cap

    # v7x megacore: if the grid would collapse to a single block on a
    # non-trivial image, split one parallel axis so both TensorCores get work.
    if is_v7:
        if pl.cdiv(R, block_rows) == 1 and pl.cdiv(L, block_cols) == 1 \
                and R * L >= (1 << 16):
            half_rows = _round_up(pl.cdiv(R, 2), row_mult)
            half_cols = _round_up(pl.cdiv(L, 2), 128)
            if half_rows < R:
                block_rows = half_rows
            elif half_cols < L:
                block_cols = half_cols

    grid = (pl.cdiv(R, block_rows), pl.cdiv(L, block_cols))

    out_itemsize = jnp.dtype(out_dtype).itemsize
    cost = pl.CostEstimate(
        flops=2 * R * L,
        transcendentals=0,
        bytes_accessed=R * L * (in_itemsize + out_itemsize) + R * 2 * 4,
    )

    cp_kwargs = dict(dimension_semantics=("parallel", "parallel"))
    if vmem_limit is not None:
        cp_kwargs["vmem_limit_bytes"] = vmem_limit

    out2d = pl.pallas_call(
        _normalization_kernel,
        out_shape=jax.ShapeDtypeStruct((R, L), out_dtype),
        grid=grid,
        in_specs=[
            # (mean, 1/std) rows: block index constant across innermost axis j,
            # so the tiny block stays resident instead of re-DMAing per step.
            pl.BlockSpec((block_rows, 2), lambda i, j: (i, 0)),
            pl.BlockSpec((block_rows, block_cols), lambda i, j: (i, j)),
        ],
        out_specs=pl.BlockSpec((block_rows, block_cols), lambda i, j: (i, j)),
        compiler_params=pltpu.CompilerParams(**cp_kwargs),
        cost_estimate=cost,
    )(mb_rows, x2d)

    return out2d.reshape(N, C, H, W)


if __name__ == "__main__":
    key = jax.random.PRNGKey(0)
    N, C, H, W = 2, 3, 16, 16

    # Standard ImageNet normalization constants (as used by the style-transfer
    # module this mirrors).
    mean = jnp.array([0.485, 0.456, 0.406], dtype=jnp.float32)
    std = jnp.array([0.229, 0.224, 0.225], dtype=jnp.float32)

    img = jax.random.uniform(key, (N, C, H, W), dtype=jnp.float32)

    out = normalization(img, mean, std)
    out = jax.block_until_ready(out)

    # Reference check (plain JAX, mirrors the PyTorch broadcasting semantics).
    ref = (img - mean.reshape(-1, 1, 1)) / std.reshape(-1, 1, 1)
    assert out.shape == (N, C, H, W)
    assert out.dtype == jnp.float32
    # Kernel computes (x - mean) * (1/std); differs from (x - mean)/std by one
    # extra f32 rounding of the reciprocal.
    assert jnp.allclose(out, ref, rtol=1e-5, atol=1e-5)

    print("KERNEL_OK")
</pallas_src>

<mosaic_0001>
module attributes {stable_mosaic.version = 11 : i64} {
  func.func @_normalization_kernel(%arg0: i32, %arg1: i32, %arg2: memref<6x2xf32, #tpu.memory_space<vmem>>, %arg3: memref<6x256xf32, #tpu.memory_space<vmem>>, %arg4: memref<6x256xf32, #tpu.memory_space<vmem>>) attributes {dimension_semantics = [#tpu.dimension_semantics<parallel>, #tpu.dimension_semantics<parallel>], iteration_bounds = array<i64: 1, 1>, scalar_prefetch = 0 : i64, scratch_operands = 0 : i64, tpu.core_type = #tpu.core_type<tc>, window_params = [{transform_indices = @transform_0, window_bounds = array<i64: 6, 2>}, {transform_indices = @transform_1, window_bounds = array<i64: 6, 256>}, {transform_indices = @transform_2, window_bounds = array<i64: 6, 256>}]} {
    %c0 = arith.constant 0 : index
    %c0_0 = arith.constant 0 : index
    %0 = vector.load %arg3[%c0, %c0_0] : memref<6x256xf32, #tpu.memory_space<vmem>>, vector<6x256xf32>
    %c0_1 = arith.constant 0 : index
    %c0_2 = arith.constant 0 : index
    %1 = vector.load %arg2[%c0_1, %c0_2] : memref<6x2xf32, #tpu.memory_space<vmem>>, vector<6x1xf32>
    %c0_3 = arith.constant 0 : index
    %c1 = arith.constant 1 : index
    %2 = vector.load %arg2[%c0_3, %c1] : memref<6x2xf32, #tpu.memory_space<vmem>>, vector<6x1xf32>
    %3 = vector.broadcast %1 : vector<6x1xf32> to vector<6x256xf32>
    %4 = arith.subf %0, %3 : vector<6x256xf32>
    %5 = vector.broadcast %2 : vector<6x1xf32> to vector<6x256xf32>
    %6 = arith.mulf %4, %5 : vector<6x256xf32>
    %c0_4 = arith.constant 0 : index
    %c0_5 = arith.constant 0 : index
    %7 = vector.load %arg4[%c0_4, %c0_5] : memref<6x256xf32, #tpu.memory_space<vmem>>, vector<6x256xf32>
    tpu.vector_store %arg4[%c0_4, %c0_5], %6 {strides = array<i32>} : memref<6x256xf32, #tpu.memory_space<vmem>>, vector<6x256xf32>,
    return
  }
  func.func @transform_0(%arg0: i32, %arg1: i32) -> (i32, i32) {
    %c0_i32 = arith.constant 0 : i32
    %c0_i32_0 = arith.constant 0 : i32
    return %arg0, %c0_i32 : i32, i32
  }
  func.func @transform_1(%arg0: i32, %arg1: i32) -> (i32, i32) {
    %c0_i32 = arith.constant 0 : i32
    return %arg0, %arg1 : i32, i32
  }
  func.func @transform_2(%arg0: i32, %arg1: i32) -> (i32, i32) {
    %c0_i32 = arith.constant 0 : i32
    return %arg0, %arg1 : i32, i32
  }
}

</mosaic_0001>

<bundles_post_ra>
// kernel: tpu_custom_call.1
= control target key start
LH: loop header
LB: loop body
LE: loop exit
PB: predicated region body
PF: predicated region fallthrough
CT: control target
= control target key end

     0   :  { %7 = vsyncpa [#allocation3], 0  ;;  %s157_s0 = inlined_call_operand.vmem [shape: f32[6,2], index: 0, kind: input, shape index: {}]   ;;  %s158_s1 = inlined_call_operand.hbm [shape: f32[6,256], index: 1, kind: input, shape index: {}]   ;;  %s159_s2 = inlined_call_operand.hbm [shape: f32[6,256], index: 2, kind: output, shape index: {}]  }
   0x1   :  { %8 = vsyncpa [#allocation4], 0  ;;  %s111_s9 = smov [#allocation2]   ;;  %s63_s13 = scalar_lea.hbm %s158_s1, 256 }
   0x2   :  { %s17_s10 = sshll.u32 %s111_s9, 4  ;;  %p64_p0 = scmp.ne.s32.totalorder %s158_s1, %s63_s13  ;;  %s18_s10 = int_to_ptr.vmem [resolvable:$true] %s17_s10 }
   0x3   :  { %p67_p1 = scmp.lt.u32.totalorder %s63_s13, %s158_s1 }
   0x5   :  { %p69_p2 = pnand %p67_p1, %p64_p0 }
   0x7   :  { %72 = shalt.err (!%p69_p2)
}
   0x8   :  { %s73_s18 = scalar_lea.vmem %s18_s10, 256  ;;  %p78_p4 = scmp.lt.s32.totalorder %s18_s10, %s18_s10 }
   0x9   :  { %p74_p3 = scmp.ne.s32.totalorder %s18_s10, %s73_s18  ;;  %p79_p5 = scmp.lt.s32.totalorder %s73_s18, %s73_s18 }
   0xb   :  { %p80_p6 = por %p79_p5, %p78_p4 }
   0xd   :  { %p81_p7 = pnand %p80_p6, %p74_p3 }
   0xf   :  { %84 = shalt.err (!%p81_p7)
}
  0x10   :  { %20 = dma.hbm_to_vmem [thread:$0]  %s158_s1, 256, %s18_s10, [#allocation3]  }
  0x11   :  { %107 = dma.done.wait [#allocation3], 256  }
  0x12   :  { %108 = vsyncadd [#allocation3], 4294967040  ;;  %v112_v0 = vmov 0   ;;  %v26_v1 = vld [vmem:[%s157_s0] sm:$0x3f]  ;;  %v113_v2 = vmov 1  }
  0x13   :  { %61 = vset.pattern.permute.xlu0 %v112_v0  ;;  %v24_v4 = vld [vmem:[#allocation2] sm:$0x3f]  ;;  %v25_v5 = vld [vmem:[#allocation2 + $0x8] sm:$0x3f]  ;;  %s114_s23 = smov [#allocation5]  }
  0x14   :  { %29 = vperm.xlu0 %61, %v26_v1   ;;  %s48_s24 = sshll.u32 %s114_s23, 4  ;;  %s49_s24 = int_to_ptr.vmem [resolvable:$true] %s48_s24 }
  0x15   :  { %s85_s1 = scalar_lea.vmem %s49_s24, 256  ;;  %p90_p9 = scmp.lt.s32.totalorder %s49_s24, %s49_s24 }
  0x16   :  { %p86_p8 = scmp.ne.s32.totalorder %s49_s24, %s85_s1  ;;  %p91_p10 = scmp.lt.s32.totalorder %s85_s1, %s85_s1 }
  0x18   :  { %62 = vset.pattern.permute.xlu0 %v113_v2  ;;  %p92_p11 = por %p91_p10, %p90_p9 }
  0x19   :  { %35 = vperm.xlu0 %62, %v26_v1  }
  0x1a   :  { %p93_p12 = pnand %p92_p11, %p86_p8 }
  0x93   :  { %v30_v3 = vpop.permute.xlu0 %29 }
  0x94   :  { %v32_v6 = vsub.f32 %v24_v4, %v30_v3  ;;  %v33_v7 = vsub.f32 %v25_v5, %v30_v3 }
  0x98   :  { %v36_v8 = vpop.permute.xlu0 %35 }
  0x99   :  { %v38_v9 = vmul.f32 %v36_v8, %v32_v6  ;;  %v39_v10 = vmul.f32 %v36_v8, %v33_v7 }
  0x9b   :  { %40 = vst [vmem:[#allocation5] sm:$0x3f] %v38_v9  ;;  %41 = vst [vmem:[#allocation5 + $0x8] sm:$0x3f] %v39_v10 }
  0x9c   :  { %96 = shalt.err (!%p93_p12)
}
  0x9d   :  { %s97_s26 = scalar_lea.hbm %s159_s2, 256 }
  0x9e   :  { %p98_p13 = scmp.ne.s32.totalorder %s159_s2, %s97_s26  ;;  %p101_p0 = scmp.lt.u32.totalorder %s97_s26, %s159_s2 }
  0xa0   :  { %p103_p1 = pnand %p101_p0, %p98_p13 }
  0xa2   :  { %106 = shalt.err (!%p103_p1)
}
  0xa3   :  { %51 = dma.vmem_to_hbm [thread:$0]  %s49_s24, 256, %s159_s2, [#allocation4]  }
  0xa4   :  { %109 = dma.done.wait [#allocation4], 256  }
  0xa5   :  { %110 = vsyncadd [#allocation4], 4294967040 }
  0xa6   :  { %55 = vsyncpa [#allocation3], 1 }
  0xa7   :  { %56 = vsyncpa [#allocation4], 1 }

</bundles_post_ra>
